<compile_context>
chip_gen: v6e
topology: v6e:2x2x1
jax: 0.10.0
libtpu: 0.0.40
codegen_flags: <defaults>
</compile_context>

<pallas_src>
import math

import jax
import jax.numpy as jnp
from jax.experimental import pallas as pl
from jax.experimental.pallas import tpu as pltpu


def refine_kernel(vecf_ref, t_ref, w1v_ref, w1t_ref, b1_ref, w2_ref, b2_ref,
                  refined_ref, weights_ref):
    """One batch-block of the forward pass.

    vecf_ref : (BB*K, D) flattened vectors block (flatten done in wrapper)
    t_ref    : (BB, T)
    w1v_ref  : (D, H)  linear-1 weight, vector part
    w1t_ref  : (T, H)  linear-1 weight, t-embed part
    b1_ref   : (1, H)
    w2_ref   : (1, H)  linear-2 weight as a row vector
    b2_ref   : (1, 1)  scalar in SMEM
    refined_ref : (BB, D)
    weights_ref : (BB, K)
    """
    vf = vecf_ref[...]                       # (BB*K, D) f32
    t_embed = t_ref[...]                     # (BB, T)
    BB = t_embed.shape[0]
    BBK, D = vf.shape
    K = BBK // BB
    H = w1v_ref.shape[1]

    # ---- Linear 1 (split across the concat boundary), single 2-D MXU matmul
    h = jnp.dot(vf, w1v_ref[...], preferred_element_type=jnp.float32)        # (BB*K, H)
    ht = jnp.dot(t_embed, w1t_ref[...], preferred_element_type=jnp.float32)  # (BB, H)

    # (BB*K, H) -> (BB, K, H) is a layout no-op when K % 8 == 0 (K=8 here).
    h3 = h.reshape(BB, K, H) + ht[:, None, :] + b1_ref[...]
    h3 = jnp.maximum(h3, 0.0)                                                # (BB, K, H)

    # ---- Linear 2 (H -> 1) on the VPU: broadcast multiply + lane reduce ----
    scores = jnp.sum(h3 * w2_ref[...], axis=-1) + b2_ref[0, 0]               # (BB, K)

    # ---- softmax over K (numerically stable) ----
    m = jnp.max(scores, axis=-1, keepdims=True)
    e = jnp.exp(scores - m)
    w = e / jnp.sum(e, axis=-1, keepdims=True)                               # (BB, K)

    # ---- weighted sum over K: VPU multiply + sublane reduce (no MXU) ----
    v3 = vf.reshape(BB, K, D)
    refined = jnp.sum(w[..., None] * v3, axis=1)                             # (BB, D)

    refined_ref[...] = refined.astype(refined_ref.dtype)
    weights_ref[...] = w.astype(weights_ref.dtype)


def _pick_batch_block(B, target=128):
    """Largest batch block <= target that divides B, preferring multiples of 8."""
    if B <= target:
        return B
    for bb in range(target, 7, -1):
        if B % bb == 0 and bb % 8 == 0:
            return bb
    for bb in range(target, 0, -1):
        if B % bb == 0:
            return bb
    return B


def refine_noise_net(vectors, t_embed, params, *, batch_block=None):
    """Pallas implementation of RefineNoiseNet.forward.

    vectors: (B, K, D) float32
    t_embed: (B, T)    float32
    params:  (w1v (D,H), w1t (T,H), b1 (1,H), w2 (H,1), b2 (1,1))
    returns: refined (B, D), weights (B, K)
    """
    B, K, D = vectors.shape
    T = t_embed.shape[-1]
    w1v, w1t, b1, w2, b2 = params
    H = w1v.shape[1]

    BB = batch_block if batch_block is not None else _pick_batch_block(B)
    assert B % BB == 0, "batch block must divide B"
    grid = (B // BB,)

    # Wrapper-side layout plumbing (free in HBM):
    vec_flat = vectors.reshape(B * K, D)     # (B*K, D)
    w2_row = w2.reshape(1, H)                # (H, 1) -> (1, H)
    b2_s = b2.reshape(1, 1)

    refined, weights = pl.pallas_call(
        refine_kernel,
        out_shape=(jax.ShapeDtypeStruct((B, D), vectors.dtype),
                   jax.ShapeDtypeStruct((B, K), vectors.dtype)),
        grid=grid,
        in_specs=[
            pl.BlockSpec((BB * K, D), lambda i: (i, 0)),         # vectors (flat, pipelined)
            pl.BlockSpec((BB, T), lambda i: (i, 0)),             # t_embed (pipelined)
            pl.BlockSpec((D, H), lambda i: (0, 0)),              # w1v (VMEM-resident)
            pl.BlockSpec((T, H), lambda i: (0, 0)),              # w1t
            pl.BlockSpec((1, H), lambda i: (0, 0)),              # b1
            pl.BlockSpec((1, H), lambda i: (0, 0)),              # w2 row
            pl.BlockSpec(memory_space=pltpu.MemorySpace.SMEM),   # b2 scalar
        ],
        out_specs=(
            pl.BlockSpec((BB, D), lambda i: (i, 0)),             # refined
            pl.BlockSpec((BB, K), lambda i: (i, 0)),             # weights
        ),
        compiler_params=pltpu.CompilerParams(
            dimension_semantics=("parallel",),                   # megacore on v7x
            vmem_limit_bytes=32 * 1024 * 1024,                   # safe on v5e/v6e/v7x
        ),
    )(vec_flat, t_embed, w1v, w1t, b1, w2_row, b2_s)
    return refined, weights


def init_params(key, vector_dim, t_embed_dim, hidden_dim):
    """Deterministic PyTorch-style (uniform ±1/sqrt(fan_in)) init."""
    in1 = vector_dim + t_embed_dim
    k1 = 1.0 / math.sqrt(in1)
    k2 = 1.0 / math.sqrt(hidden_dim)
    ks = jax.random.split(key, 4)
    w1 = jax.random.uniform(ks[0], (in1, hidden_dim), jnp.float32, -k1, k1)
    b1 = jax.random.uniform(ks[1], (1, hidden_dim), jnp.float32, -k1, k1)
    w2 = jax.random.uniform(ks[2], (hidden_dim, 1), jnp.float32, -k2, k2)
    b2 = jax.random.uniform(ks[3], (1, 1), jnp.float32, -k2, k2)
    w1v = w1[:vector_dim]      # (D, H)
    w1t = w1[vector_dim:]      # (T, H)
    return (w1v, w1t, b1, w2, b2)


def reference_forward(vectors, t_embed, params):
    """Pure-JAX reference matching the PyTorch module semantics."""
    w1v, w1t, b1, w2, b2 = params
    B, K, D = vectors.shape
    t_exp = jnp.broadcast_to(t_embed[:, None, :], (B, K, t_embed.shape[-1]))
    x = jnp.concatenate([vectors, t_exp], axis=-1)
    w1 = jnp.concatenate([w1v, w1t], axis=0)
    h = jnp.maximum(x @ w1 + b1[0], 0.0)
    scores = (h @ w2)[..., 0] + b2[0, 0]
    weights = jax.nn.softmax(scores, axis=-1)
    refined = jnp.sum(weights[..., None] * vectors, axis=1)
    return refined, weights


if __name__ == "__main__":
    B, K, D, T, H = 2, 8, 32, 16, 32

    key = jax.random.PRNGKey(0)
    k_vec, k_t, k_param = jax.random.split(key, 3)

    vectors = jax.random.normal(k_vec, (B, K, D), jnp.float32)
    t_embed = jax.random.normal(k_t, (B, T), jnp.float32)
    params = init_params(k_param, D, T, H)

    refined, weights = refine_noise_net(vectors, t_embed, params)
    refined = jax.block_until_ready(refined)
    weights = jax.block_until_ready(weights)

    ref_refined, ref_weights = reference_forward(vectors, t_embed, params)
    assert refined.shape == (B, D) and weights.shape == (B, K)
    assert jnp.allclose(refined, ref_refined, atol=1e-5, rtol=1e-5)
    assert jnp.allclose(weights, ref_weights, atol=1e-5, rtol=1e-5)
    assert jnp.allclose(jnp.sum(weights, axis=-1), 1.0, atol=1e-5)

    print("KERNEL_OK")
</pallas_src>

<mosaic_0001>
module attributes {stable_mosaic.version = 11 : i64} {
  func.func @refine_kernel(%arg0: i32, %arg1: memref<16x32xf32, #tpu.memory_space<vmem>>, %arg2: memref<2x16xf32, #tpu.memory_space<vmem>>, %arg3: memref<32x32xf32, #tpu.memory_space<vmem>>, %arg4: memref<16x32xf32, #tpu.memory_space<vmem>>, %arg5: memref<1x32xf32, #tpu.memory_space<vmem>>, %arg6: memref<1x32xf32, #tpu.memory_space<vmem>>, %arg7: memref<1x1xf32, #tpu.memory_space<smem>>, %arg8: memref<2x32xf32, #tpu.memory_space<vmem>>, %arg9: memref<2x8xf32, #tpu.memory_space<vmem>>) attributes {dimension_semantics = [#tpu.dimension_semantics<parallel>], iteration_bounds = array<i64: 1>, scalar_prefetch = 0 : i64, scratch_operands = 0 : i64, tpu.core_type = #tpu.core_type<tc>, window_params = [{transform_indices = @transform_0, window_bounds = array<i64: 16, 32>}, {transform_indices = @transform_1, window_bounds = array<i64: 2, 16>}, {pipeline_mode = #tpu.pipeline_mode<synchronous>, transform_indices = @transform_2, window_bounds = array<i64: 32, 32>}, {pipeline_mode = #tpu.pipeline_mode<synchronous>, transform_indices = @transform_3, window_bounds = array<i64: 16, 32>}, {pipeline_mode = #tpu.pipeline_mode<synchronous>, transform_indices = @transform_4, window_bounds = array<i64: 1, 32>}, {pipeline_mode = #tpu.pipeline_mode<synchronous>, transform_indices = @transform_5, window_bounds = array<i64: 1, 32>}, {transform_indices = @transform_6, window_bounds = array<i64: 1, 1>}, {transform_indices = @transform_7, window_bounds = array<i64: 2, 32>}, {transform_indices = @transform_8, window_bounds = array<i64: 2, 8>}]} {
    %c0 = arith.constant 0 : index
    %c0_0 = arith.constant 0 : index
    %0 = vector.load %arg1[%c0, %c0_0] : memref<16x32xf32, #tpu.memory_space<vmem>>, vector<16x32xf32>
    %c0_1 = arith.constant 0 : index
    %c0_2 = arith.constant 0 : index
    %1 = vector.load %arg2[%c0_1, %c0_2] : memref<2x16xf32, #tpu.memory_space<vmem>>, vector<2x16xf32>
    %c0_3 = arith.constant 0 : index
    %c0_4 = arith.constant 0 : index
    %2 = vector.load %arg3[%c0_3, %c0_4] : memref<32x32xf32, #tpu.memory_space<vmem>>, vector<32x32xf32>
    %cst = arith.constant dense<0.000000e+00> : vector<16x32xf32>
    %3 = tpu.matmul %0, %2, %cst {dimension_numbers = #tpu.dot_dimension_numbers<[1], [0], [0], [1], [0, 0, 1, 1], [], []>} : vector<16x32xf32>, vector<32x32xf32>, vector<16x32xf32> -> vector<16x32xf32>
    %c0_5 = arith.constant 0 : index
    %c0_6 = arith.constant 0 : index
    %4 = vector.load %arg4[%c0_5, %c0_6] : memref<16x32xf32, #tpu.memory_space<vmem>>, vector<16x32xf32>
    %cst_7 = arith.constant dense<0.000000e+00> : vector<2x32xf32>
    %5 = tpu.matmul %1, %4, %cst_7 {dimension_numbers = #tpu.dot_dimension_numbers<[1], [0], [0], [1], [0, 0, 1, 1], [], []>} : vector<2x16xf32>, vector<16x32xf32>, vector<2x32xf32> -> vector<2x32xf32>
    %6 = vector.shape_cast %3 : vector<16x32xf32> to vector<2x8x32xf32>
    %7 = vector.shape_cast %5 : vector<2x32xf32> to vector<2x1x32xf32>
    %8 = vector.broadcast %7 : vector<2x1x32xf32> to vector<2x8x32xf32>
    %9 = arith.addf %6, %8 : vector<2x8x32xf32>
    %c0_8 = arith.constant 0 : index
    %c0_9 = arith.constant 0 : index
    %10 = vector.load %arg5[%c0_8, %c0_9] : memref<1x32xf32, #tpu.memory_space<vmem>>, vector<1x32xf32>
    %11 = vector.shape_cast %10 : vector<1x32xf32> to vector<1x1x32xf32>
    %12 = vector.broadcast %11 : vector<1x1x32xf32> to vector<2x8x32xf32>
    %13 = arith.addf %9, %12 : vector<2x8x32xf32>
    %cst_10 = arith.constant 0.000000e+00 : f32
    %14 = vector.broadcast %cst_10 : f32 to vector<2x8x32xf32>
    %15 = arith.maximumf %13, %14 : vector<2x8x32xf32>
    %c0_11 = arith.constant 0 : index
    %c0_12 = arith.constant 0 : index
    %16 = vector.load %arg6[%c0_11, %c0_12] : memref<1x32xf32, #tpu.memory_space<vmem>>, vector<1x32xf32>
    %17 = vector.shape_cast %16 : vector<1x32xf32> to vector<1x1x32xf32>
    %18 = vector.broadcast %17 : vector<1x1x32xf32> to vector<2x8x32xf32>
    %19 = arith.mulf %15, %18 : vector<2x8x32xf32>
    %cst_13 = arith.constant dense<0.000000e+00> : vector<2x8xf32>
    %20 = vector.multi_reduction <add>, %19, %cst_13 [2] : vector<2x8x32xf32> to vector<2x8xf32>
    %c0_14 = arith.constant 0 : index
    %c0_15 = arith.constant 0 : index
    %21 = memref.load %arg7[%c0_14, %c0_15] : memref<1x1xf32, #tpu.memory_space<smem>>
    %22 = vector.broadcast %21 : f32 to vector<2x8xf32>
    %23 = arith.addf %20, %22 : vector<2x8xf32>
    %cst_16 = arith.constant dense<0xFF800000> : vector<2xf32>
    %24 = vector.multi_reduction <maximumf>, %23, %cst_16 [1] : vector<2x8xf32> to vector<2xf32>
    %25 = vector.shape_cast %24 : vector<2xf32> to vector<2x1xf32>
    %26 = vector.broadcast %25 : vector<2x1xf32> to vector<2x8xf32>
    %27 = arith.subf %23, %26 : vector<2x8xf32>
    %28 = math.exp %27 : vector<2x8xf32>
    %cst_17 = arith.constant dense<0.000000e+00> : vector<2xf32>
    %29 = vector.multi_reduction <add>, %28, %cst_17 [1] : vector<2x8xf32> to vector<2xf32>
    %30 = vector.shape_cast %29 : vector<2xf32> to vector<2x1xf32>
    %31 = vector.broadcast %30 : vector<2x1xf32> to vector<2x8xf32>
    %32 = arith.divf %28, %31 : vector<2x8xf32>
    %33 = vector.shape_cast %0 : vector<16x32xf32> to vector<2x8x32xf32>
    %34 = vector.shape_cast %32 : vector<2x8xf32> to vector<2x8x1xf32>
    %35 = vector.broadcast %34 : vector<2x8x1xf32> to vector<2x8x32xf32>
    %36 = arith.mulf %35, %33 : vector<2x8x32xf32>
    %cst_18 = arith.constant dense<0.000000e+00> : vector<2x32xf32>
    %37 = vector.multi_reduction <add>, %36, %cst_18 [1] : vector<2x8x32xf32> to vector<2x32xf32>
    %c0_19 = arith.constant 0 : index
    %c0_20 = arith.constant 0 : index
    %38 = vector.load %arg8[%c0_19, %c0_20] : memref<2x32xf32, #tpu.memory_space<vmem>>, vector<2x32xf32>
    tpu.vector_store %arg8[%c0_19, %c0_20], %37 {strides = array<i32>} : memref<2x32xf32, #tpu.memory_space<vmem>>, vector<2x32xf32>,
    %c0_21 = arith.constant 0 : index
    %c0_22 = arith.constant 0 : index
    %39 = vector.load %arg9[%c0_21, %c0_22] : memref<2x8xf32, #tpu.memory_space<vmem>>, vector<2x8xf32>
    tpu.vector_store %arg9[%c0_21, %c0_22], %32 {strides = array<i32>} : memref<2x8xf32, #tpu.memory_space<vmem>>, vector<2x8xf32>,
    return
  }
  func.func @transform_0(%arg0: i32) -> (i32, i32) {
    %c0_i32 = arith.constant 0 : i32
    %c0_i32_0 = arith.constant 0 : i32
    return %arg0, %c0_i32 : i32, i32
  }
  func.func @transform_1(%arg0: i32) -> (i32, i32) {
    %c0_i32 = arith.constant 0 : i32
    %c0_i32_0 = arith.constant 0 : i32
    return %arg0, %c0_i32 : i32, i32
  }
  func.func @transform_2(%arg0: i32) -> (i32, i32) {
    %c0_i32 = arith.constant 0 : i32
    %c0_i32_0 = arith.constant 0 : i32
    %c0_i32_1 = arith.constant 0 : i32
    return %c0_i32, %c0_i32_0 : i32, i32
  }
  func.func @transform_3(%arg0: i32) -> (i32, i32) {
    %c0_i32 = arith.constant 0 : i32
    %c0_i32_0 = arith.constant 0 : i32
    %c0_i32_1 = arith.constant 0 : i32
    return %c0_i32, %c0_i32_0 : i32, i32
  }
  func.func @transform_4(%arg0: i32) -> (i32, i32) {
    %c0_i32 = arith.constant 0 : i32
    %c0_i32_0 = arith.constant 0 : i32
    %c0_i32_1 = arith.constant 0 : i32
    return %c0_i32, %c0_i32_0 : i32, i32
  }
  func.func @transform_5(%arg0: i32) -> (i32, i32) {
    %c0_i32 = arith.constant 0 : i32
    %c0_i32_0 = arith.constant 0 : i32
    %c0_i32_1 = arith.constant 0 : i32
    return %c0_i32, %c0_i32_0 : i32, i32
  }
  func.func @transform_6(%arg0: i32) -> (i32, i32) {
    %c0_i32 = arith.constant 0 : i32
    %c0_i32_0 = arith.constant 0 : i32
    %c0_i32_1 = arith.constant 0 : i32
    return %c0_i32, %c0_i32_0 : i32, i32
  }
  func.func @transform_7(%arg0: i32) -> (i32, i32) {
    %c0_i32 = arith.constant 0 : i32
    %c0_i32_0 = arith.constant 0 : i32
    return %arg0, %c0_i32 : i32, i32
  }
  func.func @transform_8(%arg0: i32) -> (i32, i32) {
    %c0_i32 = arith.constant 0 : i32
    %c0_i32_0 = arith.constant 0 : i32
    return %arg0, %c0_i32 : i32, i32
  }
}

</mosaic_0001>

<bundles_post_ra>
// kernel: tpu_custom_call.1
= control target key start
LH: loop header
LB: loop body
LE: loop exit
PB: predicated region body
PF: predicated region fallthrough
CT: control target
= control target key end

     0   :  { %15 = vsyncpa [#allocation4], 0  ;;  %s724_s0 = inlined_call_operand.hbm [shape: f32[16,32], index: 0, kind: input, shape index: {}]   ;;  %s725_s1 = inlined_call_operand.vmem [shape: f32[2,16], index: 1, kind: input, shape index: {}]   ;;  %s726_s2 = inlined_call_operand.hbm [shape: f32[32,32], index: 2, kind: input, shape index: {}]   ;;  %s727_s3 = inlined_call_operand.hbm [shape: f32[16,32], index: 3, kind: input, shape index: {}]   ;;  %s728_s4 = inlined_call_operand.vmem [shape: f32[1,32], index: 4, kind: input, shape index: {}]   ;;  %s729_s5 = inlined_call_operand.vmem [shape: f32[1,32], index: 5, kind: input, shape index: {}]   ;;  %s730_s6 = inlined_call_operand.<no memory space> [shape: f32[1,1], index: 6, kind: input, shape index: {}]   ;;  %s731_s7 = inlined_call_operand.hbm [shape: f32[2,32], index: 7, kind: output, shape index: {0}]   ;;  %s732_s8 = inlined_call_operand.hbm [shape: f32[2,8], index: 8, kind: output, shape index: {1}]  }
   0x1   :  { %16 = vsyncpa [#allocation7], 0 }
   0x2   :  { %17 = vsyncpa [#allocation5], 0 }
   0x3   :  { %18 = vsyncpa [#allocation11], 0  ;;  %s608_s27 = smov [#allocation6]   ;;  %s609_s29 = smov [#allocation3]  }
   0x4   :  { %s38_s28 = sshll.u32 %s608_s27, 4  ;;  %s24_s30 = sshll.u32 %s609_s29, 4  ;;  %s39_s28 = int_to_ptr.vmem [resolvable:$true] %s38_s28  ;;  %s25_s30 = int_to_ptr.vmem [resolvable:$true] %s24_s30 }
   0x5   :  { %s508_s9 = scalar_lea.vmem %s39_s28, 512  ;;  %p513_p1 = scmp.lt.s32.totalorder %s39_s28, %s39_s28 }
   0x6   :  { %p509_p0 = scmp.ne.s32.totalorder %s39_s28, %s508_s9  ;;  %p514_p2 = scmp.lt.s32.totalorder %s508_s9, %s508_s9 }
   0x8   :  { %p515_p3 = por %p514_p2, %p513_p1 }
   0xa   :  { %p516_p4 = pnand %p515_p3, %p509_p0 }
   0xc   :  { %519 = shalt.err (!%p516_p4)
}
   0xd   :  { %s610_s10 = smov 128   ;;  %s611_s11 = smov 8  }
   0xe   :  { %44 = dma.hbm_to_vmem [thread:$0]  %s726_s2, 512, %s39_s28, [#allocation7], %s610_s10, %s610_s10, %s611_s11  }
   0xf   :  { %s528_s14 = scalar_lea.vmem %s25_s30, 256  ;;  %p533_p6 = scmp.lt.s32.totalorder %s25_s30, %s25_s30 }
  0x10   :  { %p529_p5 = scmp.ne.s32.totalorder %s25_s30, %s528_s14  ;;  %p534_p7 = scmp.lt.s32.totalorder %s528_s14, %s528_s14 }
  0x12   :  { %p535_p8 = por %p534_p7, %p533_p6 }
  0x14   :  { %p536_p9 = pnand %p535_p8, %p529_p5 }
  0x16   :  { %539 = shalt.err (!%p536_p9)
}
  0x17   :  { %30 = dma.hbm_to_vmem [thread:$0]  %s724_s0, 256, %s25_s30, [#allocation4], %s610_s10, %s610_s10, %s611_s11  }
  0x18   :  { %s612_s17 = smov [#allocation8]  }
  0x19   :  { %s50_s18 = sshll.u32 %s612_s17, 4  ;;  %s51_s18 = int_to_ptr.vmem [resolvable:$true] %s50_s18 }
  0x1a   :  { %s548_s19 = scalar_lea.vmem %s51_s18, 256  ;;  %p553_p11 = scmp.lt.s32.totalorder %s51_s18, %s51_s18 }
  0x1b   :  { %p549_p10 = scmp.ne.s32.totalorder %s51_s18, %s548_s19  ;;  %p554_p12 = scmp.lt.s32.totalorder %s548_s19, %s548_s19 }
  0x1d   :  { %p555_p13 = por %p554_p12, %p553_p11 }
  0x1f   :  { %p556_p0 = pnand %p555_p13, %p549_p10 }
  0x21   :  { %559 = shalt.err (!%p556_p0)
}
  0x22   :  { %56 = dma.hbm_to_vmem [thread:$0]  %s727_s3, 256, %s51_s18, [#allocation7], %s610_s10, %s610_s10, %s611_s11  }
  0x23   :  { %600 = dma.done.wait [#allocation4], 256  }
  0x24   :  { %601 = vsyncadd [#allocation4], 4294967040 }
  0x25   :  { %602 = dma.done.wait [#allocation7], 768  }
  0x26   :  { %603 = vsyncadd [#allocation7], 4294966528  ;;  %v613_v0 = vmov 0.0   ;;  %vm614_vm0 = vmmov 0   ;;  %v78_v1 = vld [vmem:[#allocation6 + $0x18] sm:$0xff]  ;;  %v162_v2 = vld [vmem:[#allocation8 + $0x8] sm:$0xff]  ;;  %v241_v12 = vlaneseq  ;;  %v299_v40 = vstv %s730_s6 }
  0x27   :  { %472 = vmatprep.subr.mxu1 %v613_v0  ;;  %476 = vmatprep.mubr.msk.f32.mxu1 %vm614_vm0, %v613_v0  ;;  %v77_v3 = vld [vmem:[#allocation6 + $0x10] sm:$0xff]  ;;  %v161_v4 = vld [vmem:[#allocation8] sm:$0xff]  ;;  %vm163_vm1 = vcmask 130048   ;;  %v76_v6 = vld [vmem:[#allocation6 + $0x8] sm:$0xff]  ;;  %vm79_vm2 = vcmask 261120   ;;  %vm314_vm3 = vcmask 1041409  }
  0x28   :  { %461 = vmatprep.subr.mxu0 %v78_v1  ;;  %473 = vmatpush3.msra.mxu1 %v162_v2  ;;  %v74_v5 = vld [vmem:[%s725_s1] sm:$0x3]  ;;  %v75_v8 = vld [vmem:[#allocation6] sm:$0xff]  ;;  %v680_v9 = vld [vmem:[#allocation3 + $0x8] sm:$0xff]  ;;  %v615_v10 = vmov 1966171168  }
  0x29   :  { %462 = vmatpush3.msra.mxu0 %v78_v1  ;;  %474 = vmatprep.subr.mxu1 %v613_v0  ;;  %v676_v7 = vld [vmem:[#allocation3] sm:$0xff]  ;;  %v239_v11 = vunpack.c.l.s4 %v615_v10  ;;  %v684_v14 = vshrl.u32 %v241_v12, 7  ;;  %v305_v39 = vand.u32 127, %v241_v12  ;;  %vm317_vm4 = vcmask 58368  }
  0x2a   :  { %463 = vmatprep.subr.mxu0 %v77_v3  ;;  %475 = vmatpush3.msra.mxu1 %v161_v4  ;;  %v450_v26 = vld [vmem:[%s728_s4] ss:$0 sm:$0xff]  ;;  %v616_v50 = vmov 0  }
  0x2b   :  { %464 = vmatpush3.msra.mxu0 %v77_v3  ;;  %477 = vmatmul.mubr.msk.f32.vlgmr.msra.gmra.mxu1 %vm163_vm1, %v74_v5  ;;  %v240_v13 = vunpack.c.0.s8 %v239_v11  ;;  %v688_v18 = vsub.s32 0, %v684_v14  ;;  %v451_v32 = vld [vmem:[%s729_s5] ss:$0 sm:$0xff]  ;;  %v308_v42 = vsub.s32 %v305_v39, %v684_v14  ;;  %v328_v51 = vsub.s32 1, %v684_v14  ;;  %s617_s5 = smov [#allocation10]  }
  0x2c   :  { %465 = vmatprep.subr.mxu0 %v76_v6  ;;  %469 = vmatprep.mubr.msk.f32.mxu0 %vm79_vm2, %v676_v7  ;;  %s433_s6 = sshll.u32 %s617_s5, 4  ;;  %s434_s6 = int_to_ptr.vmem [resolvable:$true] %s433_s6 }
  0x2d   :  { %466 = vmatpush3.msra.mxu0 %v76_v6  ;;  %v243_v15 = vsub.s32 %v240_v13, %v684_v14  ;;  %491 = vset.pattern.permute.xlu0 %v616_v50  ;;  %s560_s25 = scalar_lea.vmem %s434_s6, 32  ;;  %p565_p2 = scmp.lt.s32.totalorder %s434_s6, %s434_s6 }
  0x2e   :  { %467 = vmatprep.subr.mxu0 %v75_v8  ;;  %490 = vset.pattern.permute.xlu1 %v616_v50  ;;  %p561_p1 = scmp.ne.s32.totalorder %s434_s6, %s560_s25  ;;  %p566_p3 = scmp.lt.s32.totalorder %s560_s25, %s560_s25 }
  0x2f   :  { %468 = vmatpush3.msra.mxu0 %v75_v8 }
  0x30   :  { %470 = vmatmul.mubr.msk.f32.vlgmr.msra.gmra.mxu0 %vm79_vm2, %v680_v9  ;;  %p567_p4 = por %p566_p3, %p565_p2 }
  0x32   :  { %p568_p5 = pnand %p567_p4, %p561_p1 }
  0xeb   :  { %v233_v16 = vpop.f32.mrf.mxu1 }
  0xec   :  { %v244_v17 = vrot.slane %v233_v16, %v243_v15 }
  0xed   :  { %v478_v19 = vpop.f32.mrf.mxu1 }
  0xee   :  { %v245_v20 = vcombine.high %v244_v17, %v244_v17  ;;  %v252_v21 = vrot.slane %v244_v17, %v243_v15 }
  0xf0   :  { %v471_v22 = vpop.f32.mrf.mxu0  ;;  %v259_v23 = vrot.slane %v245_v20, %v243_v15  ;;  %v263_v24 = vrot.slane %v252_v21, %v688_v18 }
  0xf2   :  { %v267_v25 = vrot.slane %v259_v23, %v688_v18  ;;  %v152_v27 = vpop.f32.mrf.mxu0 }
  0xf3   :  { %v270_v28 = vadd.f32 %v263_v24, %v152_v27 }
  0xf4   :  { %v271_v29 = vadd.f32 %v471_v22, %v267_v25 }
  0xf5   :  { %v279_v30 = vadd.f32 %v450_v26, %v270_v28 }
  0xf6   :  { %v280_v31 = vadd.f32 %v450_v26, %v271_v29 }
  0xf7   :  { %v281_v33 = vmax.f32 %v279_v30, 0.0 }
  0xf8   :  { %v282_v34 = vmax.f32 %v280_v31, 0.0 }
  0xf9   :  { %v290_v35 = vmul.f32 %v451_v32, %v281_v33 }
  0xfa   :  { %v291_v37 = vmul.f32 %v451_v32, %v282_v34 }
  0xfb   :  { %v292_v36 = vsel %vm79_vm2, %v290_v35, 0.0 }
  0xfc   :  { %293 = vadd.xlane.f32.xlu0 %v292_v36  ;;  %v295_v38 = vsel %vm79_vm2, %v291_v37, 0.0 }
 0x100   :  { %296 = vadd.xlane.f32.xlu0 %v295_v38 }
 0x185   :  { %v294_v41 = vpop.xlane.xlu0 %293 }
 0x186   :  { %v300_v43 = vadd.f32 %v299_v40, %v294_v41 }
 0x188   :  { %v309_v46 = vrot.slane %v300_v43, %v308_v42 }
 0x189   :  { %v297_v44 = vpop.xlane.xlu0 %296 }
 0x18a   :  { %v301_v45 = vadd.f32 %v299_v40, %v297_v44 }
 0x18c   :  { %v313_v47 = vrot.slane %v301_v45, %v308_v42 }
 0x18e   :  { %v315_v48 = vsel %vm314_vm3, %v313_v47, %v309_v46 }
 0x18f   :  { %v318_v49 = vsel %vm317_vm4, %v315_v48, -inf }
 0x190   :  { %319 = vmax.xlane.f32.xlu1 %v318_v49 }
 0x219   :  { %v320_v52 = vpop.xlane.xlu1 %319 }
 0x21a   :  { %v325_v53 = vrot.slane %v320_v52, %v688_v18  ;;  %v329_v54 = vrot.slane %v320_v52, %v328_v51 }
 0x21c   :  { %v332_v55 = vsub.f32 %v300_v43, %v325_v53  ;;  %v333_v56 = vsub.f32 %v301_v45, %v329_v54 }
 0x21e   :  { %v334_v57 = vmul.f32 1.442695, %v332_v55  ;;  %v336_v58 = vmul.f32 1.442695, %v333_v56 }
 0x220   :  { %492 = vpow2.f32 %v334_v57 }
 0x221   :  { %494 = vpow2.f32 %v336_v58 }
 0x22d   :  { %v493_v59 = vpop.eup %492 }
 0x22e   :  { %v495_v60 = vpop.eup %494  ;;  %341 = vperm.xlu1 %490, %v493_v59  }
 0x22f   :  { %344 = vperm.xlu0 %491, %v495_v60  }
 0x2a9   :  { %v342_v61 = vpop.permute.xlu1 %341 }
 0x2aa   :  { %v345_v62 = vpop.permute.xlu0 %344  ;;  %v349_v63 = vrot.slane %v342_v61, %v308_v42 }
 0x2ab   :  { %v353_v0 = vrot.slane %v345_v62, %v308_v42 }
 0x2ad   :  { %v354_v1 = vsel %vm314_vm3, %v353_v0, %v349_v63 }
 0x2ae   :  { %v356_v2 = vsel %vm317_vm4, %v354_v1, 0.0 }
 0x2af   :  { %357 = vadd.xlane.f32.xlu1 %v356_v2 }
 0x338   :  { %v358_v3 = vpop.xlane.xlu1 %357 }
 0x339   :  { %v363_v4 = vrot.slane %v358_v3, %v688_v18  ;;  %v367_v5 = vrot.slane %v358_v3, %v328_v51 }
 0x33b   :  { %496 = vrcp.f32 %v363_v4 }
 0x33c   :  { %498 = vrcp.f32 %v367_v5 }
 0x348   :  { %v497_v6 = vpop.eup %496 }
 0x349   :  { %v371_v8 = vmul.f32 %v497_v6, %v493_v59  ;;  %v499_v10 = vpop.eup %498 }
 0x34a   :  { %v373_v11 = vmul.f32 %v499_v10, %v495_v60 }
 0x34b   :  { %376 = vperm.xlu0 %491, %v371_v8  }
 0x34f   :  { %381 = vperm.xlu0 %491, %v373_v11  }
 0x3c6   :  { %v377_v12 = vpop.permute.xlu0 %376 }
 0x3c7   :  { %v384_v13 = vmul.f32 %v377_v12, %v676_v7  ;;  %v409_v17 = vrot.slane %v377_v12, %v308_v42 }
 0x3c9   :  { %v386_v14 = vsel %vm79_vm2, %v384_v13, 0.0 }
 0x3ca   :  { %v387_v15 = vrot.slane %v386_v14, 4  ;;  %v382_v16 = vpop.permute.xlu0 %381 }
 0x3cb   :  { %v385_v18 = vmul.f32 %v382_v16, %v680_v9  ;;  %v413_v19 = vrot.slane %v382_v16, %v308_v42 }
 0x3cc   :  { %v388_v20 = vadd.f32 %v387_v15, %v386_v14 }
 0x3cd   :  { %v393_v21 = vsel %vm79_vm2, %v385_v18, 0.0  ;;  %v414_v22 = vsel %vm314_vm3, %v413_v19, %v409_v17 }
 0x3ce   :  { %v389_v23 = vrot.slane %v388_v20, 2  ;;  %v394_v24 = vrot.slane %v393_v21, 4  ;;  %416 = vst.msk [vmem:[#allocation10] sm:$0x3] %vm317_vm4, %v414_v22 }
 0x3cf   :  { %571 = shalt.err (!%p568_p5)
}
 0x3d0   :  { %436 = dma.vmem_to_hbm [thread:$0]  %s434_s6, 32, %s732_s8, [#allocation11]   ;;  %v390_v7 = vadd.f32 %v389_v23, %v388_v20  ;;  %v395_v9 = vadd.f32 %v394_v24, %v393_v21  ;;  %vm404_vm5 = vcmask 254976  }
 0x3d1   :  { %s618_s28 = smov [#allocation9]  }
 0x3d2   :  { %v396_v25 = vrot.slane %v395_v9, 2  ;;  %v391_v26 = vrot.slane %v390_v7, 1  ;;  %s423_s29 = sshll.u32 %s618_s28, 4  ;;  %s424_s29 = int_to_ptr.vmem [resolvable:$true] %s423_s29 }
 0x3d3   :  { %s580_s30 = scalar_lea.vmem %s424_s29, 32  ;;  %p585_p7 = scmp.lt.s32.totalorder %s424_s29, %s424_s29 }
 0x3d4   :  { %v397_v27 = vadd.f32 %v396_v25, %v395_v9  ;;  %v392_v30 = vadd.f32 %v391_v26, %v390_v7  ;;  %p581_p6 = scmp.ne.s32.totalorder %s424_s29, %s580_s30  ;;  %p586_p8 = scmp.lt.s32.totalorder %s580_s30, %s580_s30 }
 0x3d6   :  { %v398_v28 = vrot.slane %v397_v27, 1  ;;  %p587_p9 = por %p586_p8, %p585_p7 }
 0x3d8   :  { %v399_v29 = vadd.f32 %v398_v28, %v397_v27  ;;  %p588_p10 = pnand %p587_p9, %p581_p6 }
 0x3da   :  { %v402_v31 = vsel %vm314_vm3, %v399_v29, %v392_v30 }
 0x3db   :  { %405 = vst.msk [vmem:[#allocation9] sm:$0x3] %vm404_vm5, %v402_v31 }
 0x3dc   :  { %591 = shalt.err (!%p588_p10)
}
 0x3dd   :  { %426 = dma.vmem_to_hbm [thread:$0]  %s424_s29, 32, %s731_s7, [#allocation5]  }
 0x3de   :  { %604 = dma.done.wait [#allocation5], 32  }
 0x3df   :  { %605 = vsyncadd [#allocation5], 4294967264 }
 0x3e0   :  { %606 = dma.done.wait [#allocation11], 32  }
 0x3e1   :  { %607 = vsyncadd [#allocation11], 4294967264 }
 0x3e2   :  { %443 = vsyncpa [#allocation4], 1 }
 0x3e3   :  { %444 = vsyncpa [#allocation7], 1 }
 0x3e4   :  { %445 = vsyncpa [#allocation5], 1 }
 0x3e5   :  { %446 = vsyncpa [#allocation11], 1 }

</bundles_post_ra>
